<compile_context>
chip_gen: v7x
topology: tpu7x:2x2x1
jax: 0.10.0
libtpu: 0.0.40
codegen_flags: <defaults>
</compile_context>

<pallas_src>
import functools
import math

import numpy as np
import jax
import jax.numpy as jnp
from jax.experimental import pallas as pl
from jax.experimental.pallas import tpu as pltpu

BN_EPS = 1e-5
NORM_EPS = 1e-12           # F.normalize default eps
NORM_EPS_SQ = 1e-24        # eps^2, used with rsqrt(max(sumsq, eps^2))
NEG_MASK = -1e30           # softmax mask for padded clusters
VMEM_CAP = 48 * 1024 * 1024  # stay well under v7x's 64 MiB per-TensorCore VMEM


# --------------------------------------------------------------------------
# Pass 1: accumulate per-cluster sum / sum-of-squares of the fc activations.
# --------------------------------------------------------------------------
def netvlad_stats_kernel(x_ref, w_ref, stats_ref, *, n_total, n_tile):
    j = pl.program_id(1)
    Bt, Nt, D = x_ref.shape
    Kp = w_ref.shape[0]

    x = x_ref[...]                                       # (Bt, Nt, D) bf16
    if n_total % n_tile != 0:
        # Ragged last N tile: zero out-of-range rows (zero rows contribute
        # exactly 0 to both sums).
        n_idx = j * n_tile + jax.lax.broadcasted_iota(jnp.int32, (Bt, Nt, 1), 1)
        x = jnp.where(n_idx < n_total, x, jnp.zeros_like(x))

    # One flattened MXU matmul: (Bt*Nt, D) x (Kp, D)^T -> (Bt*Nt, Kp), f32 acc.
    act = jax.lax.dot_general(
        x.reshape(Bt * Nt, D), w_ref[...],
        dimension_numbers=(((1,), (1,)), ((), ())),
        preferred_element_type=jnp.float32)

    s = jnp.sum(act, axis=0, keepdims=True)              # (1, Kp)
    sq = jnp.sum(act * act, axis=0, keepdims=True)       # (1, Kp)
    both = jnp.concatenate([s, sq], axis=0)              # (2, Kp)

    @pl.when(j == 0)
    def _():
        stats_ref[...] = jnp.zeros_like(stats_ref)

    # Single 2-sublane read-modify-write instead of two 1-sublane RMWs.
    stats_ref[0:1, 0:2, :] += both.reshape(1, 2, Kp)


# --------------------------------------------------------------------------
# Pass 2: fused BN (scale/shift FMA) + softmax + VLAD aggregation + norms.
# --------------------------------------------------------------------------
def netvlad_agg_kernel(x_ref, w_ref, kmean_t_ref, scale_ref, shift_ref, v_ref,
                       av_acc, asum_acc, *, n_total, n_tile):
    j = pl.program_id(1)
    Bt, Nt, D = x_ref.shape
    Kp = w_ref.shape[0]
    K = kmean_t_ref.shape[1]
    ragged = (n_total % n_tile) != 0

    x = x_ref[...]                                       # (Bt, Nt, D) bf16
    if ragged:
        n_idx = j * n_tile + jax.lax.broadcasted_iota(jnp.int32, (Bt, Nt, 1), 1)
        valid = n_idx < n_total                          # (Bt, Nt, 1)
        x = jnp.where(valid, x, jnp.zeros_like(x))       # kill OOB garbage

    # fc: one flattened MXU matmul, f32 accumulation.
    act = jax.lax.dot_general(
        x.reshape(Bt * Nt, D), w_ref[...],
        dimension_numbers=(((1,), (1,)), ((), ())),
        preferred_element_type=jnp.float32)              # (Bt*Nt, Kp)

    # Fused BatchNorm: act*scale + shift (padded clusters: 0*act - 1e30).
    act = act * scale_ref[...] + shift_ref[...]

    # Softmax over clusters; padded lanes underflow to exactly 0.
    act = act - jnp.max(act, axis=1, keepdims=True)
    e = jnp.exp(act)
    a = e * pl.reciprocal(jnp.sum(e, axis=1, keepdims=True), approx=True)

    if ragged:
        a = jnp.where(valid.reshape(Bt * Nt, 1), a, jnp.zeros_like(a))

    @pl.when(j == 0)
    def _():
        av_acc[...] = jnp.zeros_like(av_acc)
        asum_acc[...] = jnp.zeros_like(asum_acc)

    a3 = a.reshape(Bt, Nt, Kp)
    # Lane-dense accumulator (Bt, D, Kp): MXU output N-dim is Kp=128 lanes and
    # the per-step accumulate is an unmasked full-width store.
    av_acc[...] += jnp.einsum('bnd,bnk->bdk', x, a3.astype(x.dtype),
                              preferred_element_type=jnp.float32)
    asum_acc[...] += jnp.sum(a3, axis=1)                 # (Bt, Kp)

    @pl.when(j == pl.num_programs(1) - 1)
    def _():
        kmt = kmean_t_ref[...]                           # (D, K) f32
        av = av_acc[:, :, 0:K]                           # static ref slice (Bt, D, K)
        asum = asum_acc[:, 0:K]                          # (Bt, K)
        v = av - asum[:, None, :] * kmt[None, :, :]      # (Bt, D, K)

        # Intra-cluster L2 normalize over D (sublane reduce in this layout).
        # max(||v||, eps) == sqrt(max(sumsq, eps^2)).
        v = v * jax.lax.rsqrt(
            jnp.maximum(jnp.sum(v * v, axis=1, keepdims=True), NORM_EPS_SQ))
        # Global L2 normalize over the flattened (K*D) descriptor.
        v = v * jax.lax.rsqrt(
            jnp.maximum(jnp.sum(v * v, axis=(1, 2), keepdims=True), NORM_EPS_SQ))

        # One-time (D,K)->(K,D) transpose, then lane-dense (Bt, K*D) store.
        v_ref[...] = jnp.transpose(v, (0, 2, 1)).reshape(Bt, K * D).astype(v_ref.dtype)


# --------------------------------------------------------------------------
# Tiling / VMEM helpers
# --------------------------------------------------------------------------
def _pick_batch_tile(b):
    # Prefer >= 2 blocks along the "parallel" B axis (v7x has 2 TensorCores)
    # while keeping the output block's sublane dim a multiple of 8 or full-B.
    for bt in (32, 24, 16, 8):
        if b % bt == 0 and b // bt >= 2:
            return bt
    return b


def _pick_n_tile(n):
    for cand in (1024, 512, 256, 128):
        if n % cand == 0:
            return cand
    if n < 512:
        return n            # single full tile, no masking needed
    return 512              # ragged last tile, masked in-kernel


def _vmem_limit_bytes(Bt, Nt, D, K, Kp):
    bf16, f32 = 2, 4
    x_tile = 2 * Bt * Nt * D * bf16          # double-buffered input tile
    w_tile = 2 * Kp * D * bf16
    kmean_t = 2 * D * K * f32
    bn = 2 * 2 * Kp * f32
    act_tmp = 3 * Bt * Nt * Kp * f32         # act / exp / softmax temporaries
    av_acc = Bt * D * Kp * f32
    asum_acc = Bt * Kp * f32
    out_tile = 2 * Bt * K * D * f32
    stats = 2 * 8 * Kp * f32
    need = (x_tile + w_tile + kmean_t + bn + act_tmp + av_acc + asum_acc
            + out_tile + stats)
    return int(min(max(int(need * 1.5) + (2 << 20), 16 << 20), VMEM_CAP))


# --------------------------------------------------------------------------
# Wrapper
# --------------------------------------------------------------------------
def netvlad_forward(x, w, k_mean, gamma, beta):
    B, N, D = x.shape
    K = w.shape[0]
    Kp = ((K + 127) // 128) * 128            # lane-full cluster dimension

    Bt = _pick_batch_tile(B)
    Nt = _pick_n_tile(N)
    nb = B // Bt
    nn = pl.cdiv(N, Nt)

    # Feed the MXU in bf16; all accumulation / post-matmul math stays f32.
    x_mx = x.astype(jnp.bfloat16)
    w_pad = jnp.zeros((Kp, D), jnp.bfloat16).at[:K, :].set(w.astype(jnp.bfloat16))

    cparams = pltpu.CompilerParams(
        dimension_semantics=("parallel", "arbitrary"),
        vmem_limit_bytes=_vmem_limit_bytes(Bt, Nt, D, K, Kp))

    # ---- pass 1: BN batch statistics over all (B*N, K) rows ----
    stats = pl.pallas_call(
        functools.partial(netvlad_stats_kernel, n_total=N, n_tile=Nt),
        out_shape=jax.ShapeDtypeStruct((nb, 8, Kp), jnp.float32),
        grid=(nb, nn),
        in_specs=[pl.BlockSpec((Bt, Nt, D), lambda i, j: (i, j, 0)),
                  pl.BlockSpec((Kp, D), lambda i, j: (0, 0))],
        out_specs=pl.BlockSpec((1, 8, Kp), lambda i, j: (i, 0, 0)),
        compiler_params=cparams,
    )(x_mx, w_pad)

    stats = jnp.sum(stats, axis=0)                       # (8, Kp)
    act_sum, act_sq = stats[0], stats[1]                 # (Kp,)

    cnt = float(B * N)
    mean = act_sum / cnt
    # Biased (training-mode) variance.  E[x^2]-E[x]^2 in f32 is adequate for
    # BN-scale activations; clamp guards against tiny negative round-off.
    var = jnp.maximum(act_sq / cnt - mean * mean, 0.0)
    gamma_p = jnp.zeros((Kp,), jnp.float32).at[:K].set(
        gamma.reshape(K).astype(jnp.float32))
    beta_p = jnp.full((Kp,), NEG_MASK, jnp.float32).at[:K].set(
        beta.reshape(K).astype(jnp.float32))
    scale = gamma_p * jax.lax.rsqrt(var + BN_EPS)        # padded clusters -> 0
    shift = beta_p - mean * scale                        # padded clusters -> -1e30

    k_mean_t = jnp.transpose(k_mean.astype(jnp.float32))  # (D, K) for bdk layout

    # ---- pass 2: BN + softmax + VLAD aggregation + normalization ----
    v = pl.pallas_call(
        functools.partial(netvlad_agg_kernel, n_total=N, n_tile=Nt),
        out_shape=jax.ShapeDtypeStruct((B, K * D), jnp.float32),
        grid=(nb, nn),
        in_specs=[pl.BlockSpec((Bt, Nt, D), lambda i, j: (i, j, 0)),
                  pl.BlockSpec((Kp, D), lambda i, j: (0, 0)),
                  pl.BlockSpec((D, K), lambda i, j: (0, 0)),
                  pl.BlockSpec((1, Kp), lambda i, j: (0, 0)),
                  pl.BlockSpec((1, Kp), lambda i, j: (0, 0))],
        out_specs=pl.BlockSpec((Bt, K * D), lambda i, j: (i, 0)),
        scratch_shapes=[pltpu.VMEM((Bt, D, Kp), jnp.float32),
                        pltpu.VMEM((Bt, Kp), jnp.float32)],
        compiler_params=cparams,
    )(x_mx, w_pad, k_mean_t, scale.reshape(1, Kp), shift.reshape(1, Kp))
    return v


# --------------------------------------------------------------------------
# Pure-JAX reference mirroring the PyTorch forward (add_BN=True, train mode).
# --------------------------------------------------------------------------
def netvlad_reference(x, w, k_mean, gamma, beta):
    B, N, D = x.shape
    K = w.shape[0]
    act = jnp.einsum('bnd,kd->bnk', x, w)
    flat = act.reshape(-1, K)
    mean = jnp.mean(flat, axis=0)
    var = jnp.mean((flat - mean) ** 2, axis=0)
    flat = (flat - mean) / jnp.sqrt(var + BN_EPS) * gamma.reshape(K) + beta.reshape(K)
    act = flat.reshape(B, N, K)
    act = jax.nn.softmax(act, axis=2)
    core = x[:, :, None, :] - k_mean[None, None, :, :]
    v = jnp.sum(act[:, :, :, None] * core, axis=1)                     # (B, K, D)
    v = v / jnp.maximum(jnp.linalg.norm(v, axis=2, keepdims=True), NORM_EPS)
    v = v.reshape(B, -1)
    v = v / jnp.maximum(jnp.linalg.norm(v, axis=1, keepdims=True), NORM_EPS)
    return v


if __name__ == "__main__":
    B, N, D, K = 2, 8, 32, 16

    key = jax.random.PRNGKey(0)
    kx, kw, kc = jax.random.split(key, 3)

    x = jax.random.normal(kx, (B, N, D), dtype=jnp.float32)

    # fc weight: xavier_normal-style init, deterministic
    xavier_std = math.sqrt(2.0 / (D + K))
    w = jax.random.normal(kw, (K, D), dtype=jnp.float32) * xavier_std

    # cluster centers: randn(k, d) / sqrt(d)
    k_mean = jax.random.normal(kc, (K, D), dtype=jnp.float32) * (1.0 / math.sqrt(D))

    # BatchNorm1d(k) params at init: gamma=1, beta=0
    gamma = jnp.ones((1, K), dtype=jnp.float32)
    beta = jnp.zeros((1, K), dtype=jnp.float32)

    out = jax.block_until_ready(netvlad_forward(x, w, k_mean, gamma, beta))

    # Reference sees the same bf16-rounded x/w that the kernel feeds the MXU;
    # remaining tolerance covers the bf16 softmax-weight cast and the EUP
    # approximate reciprocal in the kernel.
    x_r = x.astype(jnp.bfloat16).astype(jnp.float32)
    w_r = w.astype(jnp.bfloat16).astype(jnp.float32)
    ref = jax.block_until_ready(netvlad_reference(x_r, w_r, k_mean, gamma, beta))

    if not np.allclose(np.asarray(out), np.asarray(ref), atol=1e-2, rtol=1e-2):
        raise AssertionError("Pallas NetVLAD output does not match JAX reference")

    print("KERNEL_OK")
</pallas_src>

<mosaic_0001>
module attributes {stable_mosaic.version = 11 : i64} {
  func.func @netvlad_stats_kernel(%arg0: i32, %arg1: i32, %arg2: memref<2x8x32xbf16, #tpu.memory_space<vmem>>, %arg3: memref<128x32xbf16, #tpu.memory_space<vmem>>, %arg4: memref<1x8x128xf32, #tpu.memory_space<vmem>>) attributes {dimension_semantics = [#tpu.dimension_semantics<parallel>, #tpu.dimension_semantics<arbitrary>], iteration_bounds = array<i64: 1, 1>, scalar_prefetch = 0 : i64, scratch_operands = 0 : i64, tpu.core_type = #tpu.core_type<tc>, window_params = [{transform_indices = @transform_0, window_bounds = array<i64: 2, 8, 32>}, {pipeline_mode = #tpu.pipeline_mode<synchronous>, transform_indices = @transform_1, window_bounds = array<i64: 128, 32>}, {transform_indices = @transform_2, window_bounds = array<i64: 1, 8, 128>}]} {
    %c0 = arith.constant 0 : index
    %c0_0 = arith.constant 0 : index
    %c0_1 = arith.constant 0 : index
    %0 = vector.load %arg2[%c0, %c0_0, %c0_1] : memref<2x8x32xbf16, #tpu.memory_space<vmem>>, vector<2x8x32xbf16>
    %1 = vector.shape_cast %0 : vector<2x8x32xbf16> to vector<16x32xbf16>
    %c0_2 = arith.constant 0 : index
    %c0_3 = arith.constant 0 : index
    %2 = vector.load %arg3[%c0_2, %c0_3] : memref<128x32xbf16, #tpu.memory_space<vmem>>, vector<128x32xbf16>
    %cst = arith.constant dense<0.000000e+00> : vector<16x128xf32>
    %3 = tpu.matmul %1, %2, %cst {dimension_numbers = #tpu.dot_dimension_numbers<[1], [1], [0], [0], [0, 0, 1, 0], [], []>} : vector<16x32xbf16>, vector<128x32xbf16>, vector<16x128xf32> -> vector<16x128xf32>
    %cst_4 = arith.constant dense<0.000000e+00> : vector<128xf32>
    %4 = vector.multi_reduction <add>, %3, %cst_4 [0] : vector<16x128xf32> to vector<128xf32>
    %5 = vector.shape_cast %4 : vector<128xf32> to vector<1x128xf32>
    %6 = arith.mulf %3, %3 : vector<16x128xf32>
    %cst_5 = arith.constant dense<0.000000e+00> : vector<128xf32>
    %7 = vector.multi_reduction <add>, %6, %cst_5 [0] : vector<16x128xf32> to vector<128xf32>
    %8 = vector.shape_cast %7 : vector<128xf32> to vector<1x128xf32>
    %9 = tpu.concatenate %5, %8 in 0 : vector<1x128xf32>, vector<1x128xf32> -> vector<2x128xf32>
    %c0_i32 = arith.constant 0 : i32
    %10 = arith.cmpi eq, %arg1, %c0_i32 : i32
    %11 = arith.extui %10 : i1 to i32
    %c0_i32_6 = arith.constant 0 : i32
    %12 = arith.cmpi ne, %11, %c0_i32_6 : i32
    scf.if %12 {
      %cst_13 = arith.constant 0.000000e+00 : f32
      %17 = vector.broadcast %cst_13 : f32 to vector<1x8x128xf32>
      %c0_14 = arith.constant 0 : index
      %c0_15 = arith.constant 0 : index
      %c0_16 = arith.constant 0 : index
      %18 = vector.load %arg4[%c0_14, %c0_15, %c0_16] : memref<1x8x128xf32, #tpu.memory_space<vmem>>, vector<1x8x128xf32>
      tpu.vector_store %arg4[%c0_14, %c0_15, %c0_16], %17 {strides = array<i32>} : memref<1x8x128xf32, #tpu.memory_space<vmem>>, vector<1x8x128xf32>,
    } else {
    }
    %c0_7 = arith.constant 0 : index
    %c0_8 = arith.constant 0 : index
    %c0_9 = arith.constant 0 : index
    %13 = vector.load %arg4[%c0_7, %c0_8, %c0_9] : memref<1x8x128xf32, #tpu.memory_space<vmem>>, vector<1x2x128xf32>
    %14 = vector.shape_cast %9 : vector<2x128xf32> to vector<1x2x128xf32>
    %15 = arith.addf %13, %14 : vector<1x2x128xf32>
    %c0_10 = arith.constant 0 : index
    %c0_11 = arith.constant 0 : index
    %c0_12 = arith.constant 0 : index
    %16 = vector.load %arg4[%c0_10, %c0_11, %c0_12] : memref<1x8x128xf32, #tpu.memory_space<vmem>>, vector<1x2x128xf32>
    tpu.vector_store %arg4[%c0_10, %c0_11, %c0_12], %15 {strides = array<i32>} : memref<1x8x128xf32, #tpu.memory_space<vmem>>, vector<1x2x128xf32>,
    return
  }
  func.func @transform_0(%arg0: i32, %arg1: i32) -> (i32, i32, i32) {
    %c0_i32 = arith.constant 0 : i32
    %c0_i32_0 = arith.constant 0 : i32
    return %arg0, %arg1, %c0_i32 : i32, i32, i32
  }
  func.func @transform_1(%arg0: i32, %arg1: i32) -> (i32, i32) {
    %c0_i32 = arith.constant 0 : i32
    %c0_i32_0 = arith.constant 0 : i32
    %c0_i32_1 = arith.constant 0 : i32
    return %c0_i32, %c0_i32_0 : i32, i32
  }
  func.func @transform_2(%arg0: i32, %arg1: i32) -> (i32, i32, i32) {
    %c0_i32 = arith.constant 0 : i32
    %c0_i32_0 = arith.constant 0 : i32
    %c0_i32_1 = arith.constant 0 : i32
    return %arg0, %c0_i32, %c0_i32_0 : i32, i32, i32
  }
}

</mosaic_0001>

<bundles_post_ra>
// kernel: tpu_custom_call.1
= control target key start
LH: loop header
LB: loop body
LE: loop exit
PB: predicated region body
PF: predicated region fallthrough
CT: control target
= control target key end

     0   :  { %v260_v1 = vmov 0.0   ;;  %vm76_vm0 = vcmask 261120   ;;  %vm261_vm1 = vmmov 0   ;;  %s326_s0 = inlined_call_operand.vmem [shape: bf16[2,8,32], index: 0, kind: input, shape index: {}]   ;;  %s327_s1 = inlined_call_operand.vmem [shape: bf16[128,32], index: 1, kind: input, shape index: {}]   ;;  %s328_s2 = inlined_call_operand.hbm [shape: f32[1,8,128], index: 2, kind: output, shape index: {}]  }
   0x1   :  { %v227_v0 = vld [vmem:[%s327_s1] sm:$0xff]   ;;  %204 = vmatprep.subr.bf16.mxu0 %v260_v1  ;;  %167 = vst [vmem:[#allocation2] sm:$0xff] %v260_v1  ;;  %v228_v3 = vld [vmem:[%s327_s1 + $0x8] sm:$0xff]   ;;  %220 = vmatprep.mubr.msk.bf16.mxu0 %vm261_vm1, %v260_v1 }
   0x2   :  { %v81_v2 = vsel %vm76_vm0, %v227_v0, 0  ;;  %v84_v4 = vsel %vm76_vm0, %v228_v3, 0 }
   0x3   :  { %205 = vmatpush3.bf16.xpose.msra.mxu0 %v81_v2 }
   0x4   :  { %206 = vmatprep.subr.bf16.mxu0 %v260_v1 }
   0x5   :  { %7 = vsyncpa [#allocation3], 0  ;;  %v229_v5 = vld [vmem:[%s327_s1 + $0x10] sm:$0xff]   ;;  %v230_v7 = vld [vmem:[%s327_s1 + $0x18] sm:$0xff]   ;;  %vm161_vm2 = vcmask 1040384  }
   0x6   :  { %v87_v6 = vsel %vm76_vm0, %v229_v5, 0  ;;  %v90_v8 = vsel %vm76_vm0, %v230_v7, 0  ;;  %v231_v9 = vld [vmem:[%s327_s1 + $0x20] sm:$0xff]   ;;  %v232_v11 = vld [vmem:[%s327_s1 + $0x28] sm:$0xff]   ;;  %v233_v13 = vld [vmem:[%s327_s1 + $0x30] sm:$0xff]  }
   0x7   :  { %v93_v10 = vsel %vm76_vm0, %v231_v9, 0  ;;  %v96_v12 = vsel %vm76_vm0, %v232_v11, 0  ;;  %v99_v14 = vsel %vm76_vm0, %v233_v13, 0  ;;  %v234_v15 = vld [vmem:[%s327_s1 + $0x38] sm:$0xff]   ;;  %v235_v17 = vld [vmem:[%s326_s0] sm:$0xff]   ;;  %s262_s0 = smov [#allocation2]  }
   0x8   :  { %v102_v16 = vsel %vm76_vm0, %v234_v15, 0  ;;  %v168_v38 = vld [vmem:[#allocation2] sm:$0x3]  ;;  %s177_s1 = sshll.u32 %s262_s0, 4  ;;  %s178_s1 = int_to_ptr.vmem [resolvable:$true] %s177_s1 }
   0x9   :  { %s236_s27 = scalar_lea.vmem %s178_s1, 128  ;;  %p241_p1 = scmp.lt.s32.totalorder %s178_s1, %s178_s1 }
   0xa   :  { %p237_p0 = scmp.ne.s32.totalorder %s178_s1, %s236_s27  ;;  %p242_p2 = scmp.lt.s32.totalorder %s236_s27, %s236_s27 }
   0xb   :  { %207 = vmatpush3.bf16.xpose.msra.mxu0 %v84_v4 }
   0xc   :  { %208 = vmatprep.subr.bf16.mxu0 %v260_v1  ;;  %p243_p3 = por %p242_p2, %p241_p1 }
   0xe   :  { %p244_p4 = pnand %p243_p3, %p237_p0 }
  0x13   :  { %209 = vmatpush3.bf16.xpose.msra.mxu0 %v87_v6 }
  0x14   :  { %210 = vmatprep.subr.bf16.mxu0 %v260_v1 }
  0x1b   :  { %211 = vmatpush3.bf16.xpose.msra.mxu0 %v90_v8 }
  0x1c   :  { %212 = vmatprep.subr.bf16.mxu0 %v260_v1 }
  0x23   :  { %213 = vmatpush3.bf16.xpose.msra.mxu0 %v93_v10 }
  0x24   :  { %214 = vmatprep.subr.bf16.mxu0 %v260_v1 }
  0x2b   :  { %215 = vmatpush3.bf16.xpose.msra.mxu0 %v96_v12 }
  0x2c   :  { %216 = vmatprep.subr.bf16.mxu0 %v260_v1 }
  0x33   :  { %217 = vmatpush3.bf16.xpose.msra.mxu0 %v99_v14 }
  0x34   :  { %218 = vmatprep.subr.bf16.mxu0 %v260_v1 }
  0x3b   :  { %219 = vmatpush3.bf16.xpose.msra.mxu0 %v102_v16 }
  0x42   :  { %221 = vmatmul.mubr.msk.bf16.vlgmr.msra.gmra.mrb[0].mxu0 %vm76_vm0, %v235_v17 }
 0x115   :  { %v138_v18 = vpop.f32.mrb[0].mxu0 }
 0x116   :  { %v222_v19 = vpop.f32.mrb[1].mxu0  ;;  %v152_v21 = vmul.f32 %v138_v18, %v138_v18 }
 0x117   :  { %v141_v20 = vpop.f32.mrb[2].mxu0 }
 0x118   :  { %v145_v22 = vadd.f32 %v141_v20, %v138_v18  ;;  %v153_v23 = vmul.f32 %v141_v20, %v141_v20  ;;  %v223_v24 = vpop.f32.mrb[3].mxu0 }
 0x11a   :  { %v146_v25 = vrot.slane %v145_v22, 4  ;;  %v154_v26 = vadd.f32 %v153_v23, %v152_v21 }
 0x11c   :  { %v147_v27 = vadd.f32 %v146_v25, %v145_v22  ;;  %v155_v28 = vrot.slane %v154_v26, 4 }
 0x11e   :  { %v148_v29 = vrot.slane %v147_v27, 2  ;;  %v156_v30 = vadd.f32 %v155_v28, %v154_v26 }
 0x120   :  { %v149_v31 = vadd.f32 %v148_v29, %v147_v27  ;;  %v157_v32 = vrot.slane %v156_v30, 2 }
 0x122   :  { %v150_v33 = vrot.slane %v149_v31, 1  ;;  %v158_v34 = vadd.f32 %v157_v32, %v156_v30 }
 0x124   :  { %v159_v35 = vrot.slane %v158_v34, 1  ;;  %v151_v36 = vadd.f32 %v150_v33, %v149_v31 }
 0x126   :  { %v160_v37 = vadd.f32 %v159_v35, %v158_v34 }
 0x128   :  { %v162_v39 = vsel %vm161_vm2, %v151_v36, %v160_v37 }
 0x129   :  { %v169_v40 = vadd.f32 %v168_v38, %v162_v39 }
 0x12b   :  { %170 = vst [vmem:[#allocation2] sm:$0x3] %v169_v40 }
 0x12c   :  { %247 = shalt.err (!%p244_p4)
}
 0x12d   :  { %s248_s30 = scalar_lea.hbm %s328_s2, 128 }
 0x12e   :  { %p249_p5 = scmp.ne.s32.totalorder %s328_s2, %s248_s30  ;;  %p252_p6 = scmp.lt.u32.totalorder %s248_s30, %s328_s2 }
 0x130   :  { %p254_p7 = pnand %p252_p6, %p249_p5 }
 0x132   :  { %257 = shalt.err (!%p254_p7)
}
 0x133   :  { %180 = dma.vmem_to_hbm [thread:$0]  %s178_s1, 128, %s328_s2, [#allocation3]  }
 0x134   :  { %258 = dma.done.wait [#allocation3], 128  }
 0x135   :  { %259 = vsyncadd [#allocation3], 4294967168 }
 0x136   :  { %184 = vsyncpa [#allocation3], 1 }

</bundles_post_ra>
